<compile_context>
chip_gen: v7x
topology: tpu7x:2x2x1
jax: 0.10.0
libtpu: 0.0.40
codegen_flags: <defaults>
</compile_context>

<pallas_src>
import functools

import jax
import jax.numpy as jnp
from jax import lax
from jax.experimental import pallas as pl
from jax.experimental.pallas import tpu as pltpu

SUBLANE = 8    # f32 sublane tile height
LANE = 128     # lane width


def lstm_kernel(x_ref, wih_ref, whh_ref, b_ref, wfc_ref, bfc_ref,
                out_ref, xg_ref, *, seq_len, batch_p):
    """x_ref: (T*B_pad, E) bf16 time-major embedded tokens.
    wih_ref: (E, 4H) bf16, whh_ref: (H, 4H) bf16, b_ref: (1, 4H) f32 (b_ih+b_hh).
    wfc_ref: (H, 128) bf16 zero-padded, bfc_ref: (1, 128) f32 zero-padded.
    out_ref: (B_pad, 128) f32. xg_ref: (T*B_pad, 4H) f32 scratch.
    """
    h_dim = whh_ref.shape[0]

    # --- Prologue: input projection for ALL timesteps in one MXU push,
    # bias folded in once (hoisted out of the recurrence). ---
    xg_ref[...] = (
        jnp.dot(x_ref[...], wih_ref[...], preferred_element_type=jnp.float32)
        + b_ref[...])

    whh = whh_ref[...]  # hoist recurrent weight load out of the loop
    h0 = jnp.zeros((batch_p, h_dim), jnp.float32)
    c0 = jnp.zeros((batch_p, h_dim), jnp.float32)

    def step(t, carry):
        h, c = carry
        row = pl.multiple_of(t * batch_p, batch_p)        # sublane-aligned start
        x_t = xg_ref[pl.ds(row, batch_p), :]              # (B_pad, 4H) for step t
        gates = x_t + jnp.dot(h.astype(whh.dtype), whh,
                              preferred_element_type=jnp.float32)
        # Whole-vreg EUP ops (4H == 128 lanes), then static lane slices.
        # PyTorch gate order: i, f, g, o.
        sg = jax.nn.sigmoid(gates)
        tg = jnp.tanh(gates)
        i_g = sg[:, 0:h_dim]
        f_g = sg[:, h_dim:2 * h_dim]
        g_g = tg[:, 2 * h_dim:3 * h_dim]
        o_g = sg[:, 3 * h_dim:4 * h_dim]
        c_new = f_g * c + i_g * g_g
        h_new = o_g * jnp.tanh(c_new)
        return h_new, c_new

    h_last, _ = lax.fori_loop(0, seq_len, step, (h0, c0), unroll=True)

    # Fused FC + sigmoid, lane-dense (padded to 128) unmasked store.
    logits = (jnp.dot(h_last.astype(wfc_ref.dtype), wfc_ref[...],
                      preferred_element_type=jnp.float32) + bfc_ref[...])
    out_ref[...] = jax.nn.sigmoid(logits)


def lstm_model_forward(tokens, params):
    """tokens: int32 (B, T). Returns sigmoid(fc(h_T)) of shape (B, output_size)."""
    emb, w_ih, w_hh, b_ih, b_hh, w_fc, b_fc = (
        params["emb"], params["w_ih"], params["w_hh"],
        params["b_ih"], params["b_hh"], params["w_fc"], params["b_fc"])
    B, T = tokens.shape
    E = emb.shape[1]
    H = w_hh.shape[1]
    O = w_fc.shape[0]
    B_pad = max(SUBLANE, ((B + SUBLANE - 1) // SUBLANE) * SUBLANE)
    O_pad = LANE  # lane-dense output width

    # Pad batch to the sublane tile so per-step slices / the output store are
    # (8,128)-aligned; padded rows use token 0 (valid embedding row) and are
    # sliced away at the end.
    tok_p = jnp.zeros((B_pad, T), tokens.dtype).at[:B, :].set(tokens)
    # Embedding gather directly into time-major rows: row t*B_pad + b <-> tok_p[b, t].
    idx_tm = jnp.reshape(jnp.transpose(tok_p), (-1,))            # (T*B_pad,)
    x_tm = jnp.take(emb, idx_tm, axis=0).astype(jnp.bfloat16)    # (T*B_pad, E)

    # Pre-transposed weights, bf16 for the MXU; biases stay f32 (added post-acc).
    wih_t = w_ih.T.astype(jnp.bfloat16)                          # (E, 4H)
    whh_t = w_hh.T.astype(jnp.bfloat16)                          # (H, 4H)
    bias = (b_ih + b_hh).reshape(1, 4 * H).astype(jnp.float32)   # (1, 4H)
    wfc_pad = (jnp.zeros((H, O_pad), jnp.float32)
               .at[:, :O].set(w_fc.T)).astype(jnp.bfloat16)      # (H, 128)
    bfc_pad = jnp.zeros((1, O_pad), jnp.float32).at[:, :O].set(b_fc)

    kernel = functools.partial(lstm_kernel, seq_len=T, batch_p=B_pad)

    out_pad = pl.pallas_call(
        kernel,
        out_shape=jax.ShapeDtypeStruct((B_pad, O_pad), jnp.float32),
        grid=(1,),
        in_specs=[
            pl.BlockSpec((T * B_pad, E), lambda i: (0, 0)),
            pl.BlockSpec((E, 4 * H), lambda i: (0, 0)),
            pl.BlockSpec((H, 4 * H), lambda i: (0, 0)),
            pl.BlockSpec((1, 4 * H), lambda i: (0, 0)),
            pl.BlockSpec((H, O_pad), lambda i: (0, 0)),
            pl.BlockSpec((1, O_pad), lambda i: (0, 0)),
        ],
        out_specs=pl.BlockSpec((B_pad, O_pad), lambda i: (0, 0)),
        scratch_shapes=[
            pltpu.VMEM((T * B_pad, 4 * H), jnp.float32),  # x@W_ih + bias, all steps
        ],
        compiler_params=pltpu.CompilerParams(
            dimension_semantics=("arbitrary",)),
    )(x_tm, wih_t, whh_t, bias, wfc_pad, bfc_pad)

    return out_pad[:B, :O]


def lstm_model_reference(tokens, params):
    """Plain-JAX reference using the same bf16-matmul / f32-elementwise recipe."""
    emb, w_ih, w_hh, b_ih, b_hh, w_fc, b_fc = (
        params["emb"], params["w_ih"], params["w_hh"],
        params["b_ih"], params["b_hh"], params["w_fc"], params["b_fc"])
    B, T = tokens.shape
    H = w_hh.shape[1]
    x = jnp.take(emb, tokens, axis=0).astype(jnp.bfloat16)      # (B, T, E)
    wih_t = w_ih.T.astype(jnp.bfloat16)
    whh_t = w_hh.T.astype(jnp.bfloat16)
    bias = (b_ih + b_hh)[None, :]
    h = jnp.zeros((B, H), jnp.float32)
    c = jnp.zeros((B, H), jnp.float32)
    for t in range(T):
        gates = (jnp.dot(x[:, t, :], wih_t, preferred_element_type=jnp.float32)
                 + bias
                 + jnp.dot(h.astype(jnp.bfloat16), whh_t,
                           preferred_element_type=jnp.float32))
        i_g = jax.nn.sigmoid(gates[:, 0:H])
        f_g = jax.nn.sigmoid(gates[:, H:2 * H])
        g_g = jnp.tanh(gates[:, 2 * H:3 * H])
        o_g = jax.nn.sigmoid(gates[:, 3 * H:4 * H])
        c = f_g * c + i_g * g_g
        h = o_g * jnp.tanh(c)
    logits = (jnp.dot(h.astype(jnp.bfloat16), w_fc.T.astype(jnp.bfloat16),
                      preferred_element_type=jnp.float32) + b_fc[None, :])
    return jax.nn.sigmoid(logits)


def init_params(key, vocab=21, embed=36, hidden=32, output=4):
    ks = jax.random.split(key, 7)
    s = 0.1
    return {
        "emb":  s * jax.random.normal(ks[0], (vocab, embed), jnp.float32),
        "w_ih": s * jax.random.normal(ks[1], (4 * hidden, embed), jnp.float32),
        "w_hh": s * jax.random.normal(ks[2], (4 * hidden, hidden), jnp.float32),
        "b_ih": s * jax.random.normal(ks[3], (4 * hidden,), jnp.float32),
        "b_hh": s * jax.random.normal(ks[4], (4 * hidden,), jnp.float32),
        "w_fc": s * jax.random.normal(ks[5], (output, hidden), jnp.float32),
        "b_fc": s * jax.random.normal(ks[6], (output,), jnp.float32),
    }


if __name__ == "__main__":
    key = jax.random.PRNGKey(0)
    k_params, k_tok = jax.random.split(key)

    B, T = 4, 8
    hidden, output = 32, 4
    params = init_params(k_params, hidden=hidden, output=output)
    tokens = jax.random.randint(k_tok, (B, T), 0, 21, dtype=jnp.int32)

    out = lstm_model_forward(tokens, params)
    out = jax.block_until_ready(out)

    assert out.shape == (B, output)
    assert bool(jnp.all(jnp.isfinite(out)))
    assert bool(jnp.all((out > 0.0) & (out < 1.0)))  # sigmoid range

    ref = jax.block_until_ready(lstm_model_reference(tokens, params))
    assert bool(jnp.allclose(out, ref, atol=1e-2, rtol=0.0)), (
        f"max abs diff {float(jnp.max(jnp.abs(out - ref)))}")

    print("KERNEL_OK")
</pallas_src>

<mosaic_0001>
module attributes {stable_mosaic.version = 11 : i64} {
  func.func @lstm_kernel(%arg0: i32, %arg1: memref<64x36xbf16, #tpu.memory_space<vmem>>, %arg2: memref<36x128xbf16, #tpu.memory_space<vmem>>, %arg3: memref<32x128xbf16, #tpu.memory_space<vmem>>, %arg4: memref<1x128xf32, #tpu.memory_space<vmem>>, %arg5: memref<32x128xbf16, #tpu.memory_space<vmem>>, %arg6: memref<1x128xf32, #tpu.memory_space<vmem>>, %arg7: memref<8x128xf32, #tpu.memory_space<vmem>>, %arg8: memref<64x128xf32, #tpu.memory_space<vmem>>) attributes {dimension_semantics = [#tpu.dimension_semantics<arbitrary>], iteration_bounds = array<i64: 1>, scalar_prefetch = 0 : i64, scratch_operands = 1 : i64, tpu.core_type = #tpu.core_type<tc>, window_params = [{pipeline_mode = #tpu.pipeline_mode<synchronous>, transform_indices = @transform_0, window_bounds = array<i64: 64, 36>}, {pipeline_mode = #tpu.pipeline_mode<synchronous>, transform_indices = @transform_1, window_bounds = array<i64: 36, 128>}, {pipeline_mode = #tpu.pipeline_mode<synchronous>, transform_indices = @transform_2, window_bounds = array<i64: 32, 128>}, {pipeline_mode = #tpu.pipeline_mode<synchronous>, transform_indices = @transform_3, window_bounds = array<i64: 1, 128>}, {pipeline_mode = #tpu.pipeline_mode<synchronous>, transform_indices = @transform_4, window_bounds = array<i64: 32, 128>}, {pipeline_mode = #tpu.pipeline_mode<synchronous>, transform_indices = @transform_5, window_bounds = array<i64: 1, 128>}, {pipeline_mode = #tpu.pipeline_mode<synchronous>, transform_indices = @transform_6, window_bounds = array<i64: 8, 128>}]} {
    %c0 = arith.constant 0 : index
    %c0_0 = arith.constant 0 : index
    %0 = vector.load %arg1[%c0, %c0_0] : memref<64x36xbf16, #tpu.memory_space<vmem>>, vector<64x36xbf16>
    %c0_1 = arith.constant 0 : index
    %c0_2 = arith.constant 0 : index
    %1 = vector.load %arg2[%c0_1, %c0_2] : memref<36x128xbf16, #tpu.memory_space<vmem>>, vector<36x128xbf16>
    %cst = arith.constant dense<0.000000e+00> : vector<64x128xf32>
    %2 = tpu.matmul %0, %1, %cst {dimension_numbers = #tpu.dot_dimension_numbers<[1], [0], [0], [1], [0, 0, 1, 1], [], []>} : vector<64x36xbf16>, vector<36x128xbf16>, vector<64x128xf32> -> vector<64x128xf32>
    %c0_3 = arith.constant 0 : index
    %c0_4 = arith.constant 0 : index
    %3 = vector.load %arg4[%c0_3, %c0_4] : memref<1x128xf32, #tpu.memory_space<vmem>>, vector<1x128xf32>
    %4 = vector.broadcast %3 : vector<1x128xf32> to vector<64x128xf32>
    %5 = arith.addf %2, %4 : vector<64x128xf32>
    %c0_5 = arith.constant 0 : index
    %c0_6 = arith.constant 0 : index
    %6 = vector.load %arg8[%c0_5, %c0_6] : memref<64x128xf32, #tpu.memory_space<vmem>>, vector<64x128xf32>
    tpu.vector_store %arg8[%c0_5, %c0_6], %5 {strides = array<i32>} : memref<64x128xf32, #tpu.memory_space<vmem>>, vector<64x128xf32>,
    %c0_7 = arith.constant 0 : index
    %c0_8 = arith.constant 0 : index
    %7 = vector.load %arg3[%c0_7, %c0_8] : memref<32x128xbf16, #tpu.memory_space<vmem>>, vector<32x128xbf16>
    %cst_9 = arith.constant 0.000000e+00 : f32
    %8 = vector.broadcast %cst_9 : f32 to vector<8x32xf32>
    %cst_10 = arith.constant 0.000000e+00 : f32
    %9 = vector.broadcast %cst_10 : f32 to vector<8x32xf32>
    %c0_i32 = arith.constant 0 : i32
    %c8_i32 = arith.constant 8 : i32
    %10 = arith.muli %c0_i32, %c8_i32 : i32
    %11 = tpu.assume_multiple %10, 8 : i32
    %12 = arith.index_cast %11 : i32 to index
    %c0_11 = arith.constant 0 : index
    %13 = vector.load %arg8[%12, %c0_11] : memref<64x128xf32, #tpu.memory_space<vmem>>, vector<8x128xf32>
    %14 = arith.truncf %8 : vector<8x32xf32> to vector<8x32xbf16>
    %cst_12 = arith.constant dense<0.000000e+00> : vector<8x128xf32>
    %15 = tpu.matmul %14, %7, %cst_12 {dimension_numbers = #tpu.dot_dimension_numbers<[1], [0], [0], [1], [0, 0, 1, 1], [], []>} : vector<8x32xbf16>, vector<32x128xbf16>, vector<8x128xf32> -> vector<8x128xf32>
    %16 = arith.addf %13, %15 : vector<8x128xf32>
    %17 = arith.negf %16 : vector<8x128xf32>
    %18 = math.exp %17 : vector<8x128xf32>
    %cst_13 = arith.constant 1.000000e+00 : f32
    %19 = vector.broadcast %cst_13 : f32 to vector<8x128xf32>
    %20 = arith.addf %19, %18 : vector<8x128xf32>
    %21 = arith.divf %19, %20 : vector<8x128xf32>
    %22 = math.tanh %16 : vector<8x128xf32>
    %23 = vector.extract_strided_slice %21 {offsets = [0, 0], sizes = [8, 32], strides = [1, 1]} : vector<8x128xf32> to vector<8x32xf32>
    %24 = vector.extract_strided_slice %21 {offsets = [0, 32], sizes = [8, 32], strides = [1, 1]} : vector<8x128xf32> to vector<8x32xf32>
    %25 = vector.extract_strided_slice %22 {offsets = [0, 64], sizes = [8, 32], strides = [1, 1]} : vector<8x128xf32> to vector<8x32xf32>
    %26 = vector.extract_strided_slice %21 {offsets = [0, 96], sizes = [8, 32], strides = [1, 1]} : vector<8x128xf32> to vector<8x32xf32>
    %27 = arith.mulf %24, %9 : vector<8x32xf32>
    %28 = arith.mulf %23, %25 : vector<8x32xf32>
    %29 = arith.addf %27, %28 : vector<8x32xf32>
    %30 = math.tanh %29 : vector<8x32xf32>
    %31 = arith.mulf %26, %30 : vector<8x32xf32>
    %c1_i32 = arith.constant 1 : i32
    %c8_i32_14 = arith.constant 8 : i32
    %32 = arith.muli %c1_i32, %c8_i32_14 : i32
    %33 = tpu.assume_multiple %32, 8 : i32
    %34 = arith.index_cast %33 : i32 to index
    %c0_15 = arith.constant 0 : index
    %35 = vector.load %arg8[%34, %c0_15] : memref<64x128xf32, #tpu.memory_space<vmem>>, vector<8x128xf32>
    %36 = arith.truncf %31 : vector<8x32xf32> to vector<8x32xbf16>
    %cst_16 = arith.constant dense<0.000000e+00> : vector<8x128xf32>
    %37 = tpu.matmul %36, %7, %cst_16 {dimension_numbers = #tpu.dot_dimension_numbers<[1], [0], [0], [1], [0, 0, 1, 1], [], []>} : vector<8x32xbf16>, vector<32x128xbf16>, vector<8x128xf32> -> vector<8x128xf32>
    %38 = arith.addf %35, %37 : vector<8x128xf32>
    %39 = arith.negf %38 : vector<8x128xf32>
    %40 = math.exp %39 : vector<8x128xf32>
    %cst_17 = arith.constant 1.000000e+00 : f32
    %41 = vector.broadcast %cst_17 : f32 to vector<8x128xf32>
    %42 = arith.addf %41, %40 : vector<8x128xf32>
    %43 = arith.divf %41, %42 : vector<8x128xf32>
    %44 = math.tanh %38 : vector<8x128xf32>
    %45 = vector.extract_strided_slice %43 {offsets = [0, 0], sizes = [8, 32], strides = [1, 1]} : vector<8x128xf32> to vector<8x32xf32>
    %46 = vector.extract_strided_slice %43 {offsets = [0, 32], sizes = [8, 32], strides = [1, 1]} : vector<8x128xf32> to vector<8x32xf32>
    %47 = vector.extract_strided_slice %44 {offsets = [0, 64], sizes = [8, 32], strides = [1, 1]} : vector<8x128xf32> to vector<8x32xf32>
    %48 = vector.extract_strided_slice %43 {offsets = [0, 96], sizes = [8, 32], strides = [1, 1]} : vector<8x128xf32> to vector<8x32xf32>
    %49 = arith.mulf %46, %29 : vector<8x32xf32>
    %50 = arith.mulf %45, %47 : vector<8x32xf32>
    %51 = arith.addf %49, %50 : vector<8x32xf32>
    %52 = math.tanh %51 : vector<8x32xf32>
    %53 = arith.mulf %48, %52 : vector<8x32xf32>
    %c2_i32 = arith.constant 2 : i32
    %c8_i32_18 = arith.constant 8 : i32
    %54 = arith.muli %c2_i32, %c8_i32_18 : i32
    %55 = tpu.assume_multiple %54, 8 : i32
    %56 = arith.index_cast %55 : i32 to index
    %c0_19 = arith.constant 0 : index
    %57 = vector.load %arg8[%56, %c0_19] : memref<64x128xf32, #tpu.memory_space<vmem>>, vector<8x128xf32>
    %58 = arith.truncf %53 : vector<8x32xf32> to vector<8x32xbf16>
    %cst_20 = arith.constant dense<0.000000e+00> : vector<8x128xf32>
    %59 = tpu.matmul %58, %7, %cst_20 {dimension_numbers = #tpu.dot_dimension_numbers<[1], [0], [0], [1], [0, 0, 1, 1], [], []>} : vector<8x32xbf16>, vector<32x128xbf16>, vector<8x128xf32> -> vector<8x128xf32>
    %60 = arith.addf %57, %59 : vector<8x128xf32>
    %61 = arith.negf %60 : vector<8x128xf32>
    %62 = math.exp %61 : vector<8x128xf32>
    %cst_21 = arith.constant 1.000000e+00 : f32
    %63 = vector.broadcast %cst_21 : f32 to vector<8x128xf32>
    %64 = arith.addf %63, %62 : vector<8x128xf32>
    %65 = arith.divf %63, %64 : vector<8x128xf32>
    %66 = math.tanh %60 : vector<8x128xf32>
    %67 = vector.extract_strided_slice %65 {offsets = [0, 0], sizes = [8, 32], strides = [1, 1]} : vector<8x128xf32> to vector<8x32xf32>
    %68 = vector.extract_strided_slice %65 {offsets = [0, 32], sizes = [8, 32], strides = [1, 1]} : vector<8x128xf32> to vector<8x32xf32>
    %69 = vector.extract_strided_slice %66 {offsets = [0, 64], sizes = [8, 32], strides = [1, 1]} : vector<8x128xf32> to vector<8x32xf32>
    %70 = vector.extract_strided_slice %65 {offsets = [0, 96], sizes = [8, 32], strides = [1, 1]} : vector<8x128xf32> to vector<8x32xf32>
    %71 = arith.mulf %68, %51 : vector<8x32xf32>
    %72 = arith.mulf %67, %69 : vector<8x32xf32>
    %73 = arith.addf %71, %72 : vector<8x32xf32>
    %74 = math.tanh %73 : vector<8x32xf32>
    %75 = arith.mulf %70, %74 : vector<8x32xf32>
    %c3_i32 = arith.constant 3 : i32
    %c8_i32_22 = arith.constant 8 : i32
    %76 = arith.muli %c3_i32, %c8_i32_22 : i32
    %77 = tpu.assume_multiple %76, 8 : i32
    %78 = arith.index_cast %77 : i32 to index
    %c0_23 = arith.constant 0 : index
    %79 = vector.load %arg8[%78, %c0_23] : memref<64x128xf32, #tpu.memory_space<vmem>>, vector<8x128xf32>
    %80 = arith.truncf %75 : vector<8x32xf32> to vector<8x32xbf16>
    %cst_24 = arith.constant dense<0.000000e+00> : vector<8x128xf32>
    %81 = tpu.matmul %80, %7, %cst_24 {dimension_numbers = #tpu.dot_dimension_numbers<[1], [0], [0], [1], [0, 0, 1, 1], [], []>} : vector<8x32xbf16>, vector<32x128xbf16>, vector<8x128xf32> -> vector<8x128xf32>
    %82 = arith.addf %79, %81 : vector<8x128xf32>
    %83 = arith.negf %82 : vector<8x128xf32>
    %84 = math.exp %83 : vector<8x128xf32>
    %cst_25 = arith.constant 1.000000e+00 : f32
    %85 = vector.broadcast %cst_25 : f32 to vector<8x128xf32>
    %86 = arith.addf %85, %84 : vector<8x128xf32>
    %87 = arith.divf %85, %86 : vector<8x128xf32>
    %88 = math.tanh %82 : vector<8x128xf32>
    %89 = vector.extract_strided_slice %87 {offsets = [0, 0], sizes = [8, 32], strides = [1, 1]} : vector<8x128xf32> to vector<8x32xf32>
    %90 = vector.extract_strided_slice %87 {offsets = [0, 32], sizes = [8, 32], strides = [1, 1]} : vector<8x128xf32> to vector<8x32xf32>
    %91 = vector.extract_strided_slice %88 {offsets = [0, 64], sizes = [8, 32], strides = [1, 1]} : vector<8x128xf32> to vector<8x32xf32>
    %92 = vector.extract_strided_slice %87 {offsets = [0, 96], sizes = [8, 32], strides = [1, 1]} : vector<8x128xf32> to vector<8x32xf32>
    %93 = arith.mulf %90, %73 : vector<8x32xf32>
    %94 = arith.mulf %89, %91 : vector<8x32xf32>
    %95 = arith.addf %93, %94 : vector<8x32xf32>
    %96 = math.tanh %95 : vector<8x32xf32>
    %97 = arith.mulf %92, %96 : vector<8x32xf32>
    %c4_i32 = arith.constant 4 : i32
    %c8_i32_26 = arith.constant 8 : i32
    %98 = arith.muli %c4_i32, %c8_i32_26 : i32
    %99 = tpu.assume_multiple %98, 8 : i32
    %100 = arith.index_cast %99 : i32 to index
    %c0_27 = arith.constant 0 : index
    %101 = vector.load %arg8[%100, %c0_27] : memref<64x128xf32, #tpu.memory_space<vmem>>, vector<8x128xf32>
    %102 = arith.truncf %97 : vector<8x32xf32> to vector<8x32xbf16>
    %cst_28 = arith.constant dense<0.000000e+00> : vector<8x128xf32>
    %103 = tpu.matmul %102, %7, %cst_28 {dimension_numbers = #tpu.dot_dimension_numbers<[1], [0], [0], [1], [0, 0, 1, 1], [], []>} : vector<8x32xbf16>, vector<32x128xbf16>, vector<8x128xf32> -> vector<8x128xf32>
    %104 = arith.addf %101, %103 : vector<8x128xf32>
    %105 = arith.negf %104 : vector<8x128xf32>
    %106 = math.exp %105 : vector<8x128xf32>
    %cst_29 = arith.constant 1.000000e+00 : f32
    %107 = vector.broadcast %cst_29 : f32 to vector<8x128xf32>
    %108 = arith.addf %107, %106 : vector<8x128xf32>
    %109 = arith.divf %107, %108 : vector<8x128xf32>
    %110 = math.tanh %104 : vector<8x128xf32>
    %111 = vector.extract_strided_slice %109 {offsets = [0, 0], sizes = [8, 32], strides = [1, 1]} : vector<8x128xf32> to vector<8x32xf32>
    %112 = vector.extract_strided_slice %109 {offsets = [0, 32], sizes = [8, 32], strides = [1, 1]} : vector<8x128xf32> to vector<8x32xf32>
    %113 = vector.extract_strided_slice %110 {offsets = [0, 64], sizes = [8, 32], strides = [1, 1]} : vector<8x128xf32> to vector<8x32xf32>
    %114 = vector.extract_strided_slice %109 {offsets = [0, 96], sizes = [8, 32], strides = [1, 1]} : vector<8x128xf32> to vector<8x32xf32>
    %115 = arith.mulf %112, %95 : vector<8x32xf32>
    %116 = arith.mulf %111, %113 : vector<8x32xf32>
    %117 = arith.addf %115, %116 : vector<8x32xf32>
    %118 = math.tanh %117 : vector<8x32xf32>
    %119 = arith.mulf %114, %118 : vector<8x32xf32>
    %c5_i32 = arith.constant 5 : i32
    %c8_i32_30 = arith.constant 8 : i32
    %120 = arith.muli %c5_i32, %c8_i32_30 : i32
    %121 = tpu.assume_multiple %120, 8 : i32
    %122 = arith.index_cast %121 : i32 to index
    %c0_31 = arith.constant 0 : index
    %123 = vector.load %arg8[%122, %c0_31] : memref<64x128xf32, #tpu.memory_space<vmem>>, vector<8x128xf32>
    %124 = arith.truncf %119 : vector<8x32xf32> to vector<8x32xbf16>
    %cst_32 = arith.constant dense<0.000000e+00> : vector<8x128xf32>
    %125 = tpu.matmul %124, %7, %cst_32 {dimension_numbers = #tpu.dot_dimension_numbers<[1], [0], [0], [1], [0, 0, 1, 1], [], []>} : vector<8x32xbf16>, vector<32x128xbf16>, vector<8x128xf32> -> vector<8x128xf32>
    %126 = arith.addf %123, %125 : vector<8x128xf32>
    %127 = arith.negf %126 : vector<8x128xf32>
    %128 = math.exp %127 : vector<8x128xf32>
    %cst_33 = arith.constant 1.000000e+00 : f32
    %129 = vector.broadcast %cst_33 : f32 to vector<8x128xf32>
    %130 = arith.addf %129, %128 : vector<8x128xf32>
    %131 = arith.divf %129, %130 : vector<8x128xf32>
    %132 = math.tanh %126 : vector<8x128xf32>
    %133 = vector.extract_strided_slice %131 {offsets = [0, 0], sizes = [8, 32], strides = [1, 1]} : vector<8x128xf32> to vector<8x32xf32>
    %134 = vector.extract_strided_slice %131 {offsets = [0, 32], sizes = [8, 32], strides = [1, 1]} : vector<8x128xf32> to vector<8x32xf32>
    %135 = vector.extract_strided_slice %132 {offsets = [0, 64], sizes = [8, 32], strides = [1, 1]} : vector<8x128xf32> to vector<8x32xf32>
    %136 = vector.extract_strided_slice %131 {offsets = [0, 96], sizes = [8, 32], strides = [1, 1]} : vector<8x128xf32> to vector<8x32xf32>
    %137 = arith.mulf %134, %117 : vector<8x32xf32>
    %138 = arith.mulf %133, %135 : vector<8x32xf32>
    %139 = arith.addf %137, %138 : vector<8x32xf32>
    %140 = math.tanh %139 : vector<8x32xf32>
    %141 = arith.mulf %136, %140 : vector<8x32xf32>
    %c6_i32 = arith.constant 6 : i32
    %c8_i32_34 = arith.constant 8 : i32
    %142 = arith.muli %c6_i32, %c8_i32_34 : i32
    %143 = tpu.assume_multiple %142, 8 : i32
    %144 = arith.index_cast %143 : i32 to index
    %c0_35 = arith.constant 0 : index
    %145 = vector.load %arg8[%144, %c0_35] : memref<64x128xf32, #tpu.memory_space<vmem>>, vector<8x128xf32>
    %146 = arith.truncf %141 : vector<8x32xf32> to vector<8x32xbf16>
    %cst_36 = arith.constant dense<0.000000e+00> : vector<8x128xf32>
    %147 = tpu.matmul %146, %7, %cst_36 {dimension_numbers = #tpu.dot_dimension_numbers<[1], [0], [0], [1], [0, 0, 1, 1], [], []>} : vector<8x32xbf16>, vector<32x128xbf16>, vector<8x128xf32> -> vector<8x128xf32>
    %148 = arith.addf %145, %147 : vector<8x128xf32>
    %149 = arith.negf %148 : vector<8x128xf32>
    %150 = math.exp %149 : vector<8x128xf32>
    %cst_37 = arith.constant 1.000000e+00 : f32
    %151 = vector.broadcast %cst_37 : f32 to vector<8x128xf32>
    %152 = arith.addf %151, %150 : vector<8x128xf32>
    %153 = arith.divf %151, %152 : vector<8x128xf32>
    %154 = math.tanh %148 : vector<8x128xf32>
    %155 = vector.extract_strided_slice %153 {offsets = [0, 0], sizes = [8, 32], strides = [1, 1]} : vector<8x128xf32> to vector<8x32xf32>
    %156 = vector.extract_strided_slice %153 {offsets = [0, 32], sizes = [8, 32], strides = [1, 1]} : vector<8x128xf32> to vector<8x32xf32>
    %157 = vector.extract_strided_slice %154 {offsets = [0, 64], sizes = [8, 32], strides = [1, 1]} : vector<8x128xf32> to vector<8x32xf32>
    %158 = vector.extract_strided_slice %153 {offsets = [0, 96], sizes = [8, 32], strides = [1, 1]} : vector<8x128xf32> to vector<8x32xf32>
    %159 = arith.mulf %156, %139 : vector<8x32xf32>
    %160 = arith.mulf %155, %157 : vector<8x32xf32>
    %161 = arith.addf %159, %160 : vector<8x32xf32>
    %162 = math.tanh %161 : vector<8x32xf32>
    %163 = arith.mulf %158, %162 : vector<8x32xf32>
    %c7_i32 = arith.constant 7 : i32
    %c8_i32_38 = arith.constant 8 : i32
    %164 = arith.muli %c7_i32, %c8_i32_38 : i32
    %165 = tpu.assume_multiple %164, 8 : i32
    %166 = arith.index_cast %165 : i32 to index
    %c0_39 = arith.constant 0 : index
    %167 = vector.load %arg8[%166, %c0_39] : memref<64x128xf32, #tpu.memory_space<vmem>>, vector<8x128xf32>
    %168 = arith.truncf %163 : vector<8x32xf32> to vector<8x32xbf16>
    %cst_40 = arith.constant dense<0.000000e+00> : vector<8x128xf32>
    %169 = tpu.matmul %168, %7, %cst_40 {dimension_numbers = #tpu.dot_dimension_numbers<[1], [0], [0], [1], [0, 0, 1, 1], [], []>} : vector<8x32xbf16>, vector<32x128xbf16>, vector<8x128xf32> -> vector<8x128xf32>
    %170 = arith.addf %167, %169 : vector<8x128xf32>
    %171 = arith.negf %170 : vector<8x128xf32>
    %172 = math.exp %171 : vector<8x128xf32>
    %cst_41 = arith.constant 1.000000e+00 : f32
    %173 = vector.broadcast %cst_41 : f32 to vector<8x128xf32>
    %174 = arith.addf %173, %172 : vector<8x128xf32>
    %175 = arith.divf %173, %174 : vector<8x128xf32>
    %176 = math.tanh %170 : vector<8x128xf32>
    %177 = vector.extract_strided_slice %175 {offsets = [0, 0], sizes = [8, 32], strides = [1, 1]} : vector<8x128xf32> to vector<8x32xf32>
    %178 = vector.extract_strided_slice %175 {offsets = [0, 32], sizes = [8, 32], strides = [1, 1]} : vector<8x128xf32> to vector<8x32xf32>
    %179 = vector.extract_strided_slice %176 {offsets = [0, 64], sizes = [8, 32], strides = [1, 1]} : vector<8x128xf32> to vector<8x32xf32>
    %180 = vector.extract_strided_slice %175 {offsets = [0, 96], sizes = [8, 32], strides = [1, 1]} : vector<8x128xf32> to vector<8x32xf32>
    %181 = arith.mulf %178, %161 : vector<8x32xf32>
    %182 = arith.mulf %177, %179 : vector<8x32xf32>
    %183 = arith.addf %181, %182 : vector<8x32xf32>
    %184 = math.tanh %183 : vector<8x32xf32>
    %185 = arith.mulf %180, %184 : vector<8x32xf32>
    %c8_i32_42 = arith.constant 8 : i32
    %186 = arith.truncf %185 : vector<8x32xf32> to vector<8x32xbf16>
    %c0_43 = arith.constant 0 : index
    %c0_44 = arith.constant 0 : index
    %187 = vector.load %arg5[%c0_43, %c0_44] : memref<32x128xbf16, #tpu.memory_space<vmem>>, vector<32x128xbf16>
    %cst_45 = arith.constant dense<0.000000e+00> : vector<8x128xf32>
    %188 = tpu.matmul %186, %187, %cst_45 {dimension_numbers = #tpu.dot_dimension_numbers<[1], [0], [0], [1], [0, 0, 1, 1], [], []>} : vector<8x32xbf16>, vector<32x128xbf16>, vector<8x128xf32> -> vector<8x128xf32>
    %c0_46 = arith.constant 0 : index
    %c0_47 = arith.constant 0 : index
    %189 = vector.load %arg6[%c0_46, %c0_47] : memref<1x128xf32, #tpu.memory_space<vmem>>, vector<1x128xf32>
    %190 = vector.broadcast %189 : vector<1x128xf32> to vector<8x128xf32>
    %191 = arith.addf %188, %190 : vector<8x128xf32>
    %192 = arith.negf %191 : vector<8x128xf32>
    %193 = math.exp %192 : vector<8x128xf32>
    %cst_48 = arith.constant 1.000000e+00 : f32
    %194 = vector.broadcast %cst_48 : f32 to vector<8x128xf32>
    %195 = arith.addf %194, %193 : vector<8x128xf32>
    %196 = arith.divf %194, %195 : vector<8x128xf32>
    %c0_49 = arith.constant 0 : index
    %c0_50 = arith.constant 0 : index
    %197 = vector.load %arg7[%c0_49, %c0_50] : memref<8x128xf32, #tpu.memory_space<vmem>>, vector<8x128xf32>
    tpu.vector_store %arg7[%c0_49, %c0_50], %196 {strides = array<i32>} : memref<8x128xf32, #tpu.memory_space<vmem>>, vector<8x128xf32>,
    return
  }
  func.func @transform_0(%arg0: i32) -> (i32, i32) {
    %c0_i32 = arith.constant 0 : i32
    %c0_i32_0 = arith.constant 0 : i32
    %c0_i32_1 = arith.constant 0 : i32
    return %c0_i32, %c0_i32_0 : i32, i32
  }
  func.func @transform_1(%arg0: i32) -> (i32, i32) {
    %c0_i32 = arith.constant 0 : i32
    %c0_i32_0 = arith.constant 0 : i32
    %c0_i32_1 = arith.constant 0 : i32
    return %c0_i32, %c0_i32_0 : i32, i32
  }
  func.func @transform_2(%arg0: i32) -> (i32, i32) {
    %c0_i32 = arith.constant 0 : i32
    %c0_i32_0 = arith.constant 0 : i32
    %c0_i32_1 = arith.constant 0 : i32
    return %c0_i32, %c0_i32_0 : i32, i32
  }
  func.func @transform_3(%arg0: i32) -> (i32, i32) {
    %c0_i32 = arith.constant 0 : i32
    %c0_i32_0 = arith.constant 0 : i32
    %c0_i32_1 = arith.constant 0 : i32
    return %c0_i32, %c0_i32_0 : i32, i32
  }
  func.func @transform_4(%arg0: i32) -> (i32, i32) {
    %c0_i32 = arith.constant 0 : i32
    %c0_i32_0 = arith.constant 0 : i32
    %c0_i32_1 = arith.constant 0 : i32
    return %c0_i32, %c0_i32_0 : i32, i32
  }
  func.func @transform_5(%arg0: i32) -> (i32, i32) {
    %c0_i32 = arith.constant 0 : i32
    %c0_i32_0 = arith.constant 0 : i32
    %c0_i32_1 = arith.constant 0 : i32
    return %c0_i32, %c0_i32_0 : i32, i32
  }
  func.func @transform_6(%arg0: i32) -> (i32, i32) {
    %c0_i32 = arith.constant 0 : i32
    %c0_i32_0 = arith.constant 0 : i32
    %c0_i32_1 = arith.constant 0 : i32
    return %c0_i32, %c0_i32_0 : i32, i32
  }
}

</mosaic_0001>

<bundles_post_ra>
// kernel: tpu_custom_call.1
= control target key start
LH: loop header
LB: loop body
LE: loop exit
PB: predicated region body
PF: predicated region fallthrough
CT: control target
= control target key end

     0   :  { %v1129_v2 = vmov 0.0   ;;  %vm93_vm0 = vcmask 1041408   ;;  %vm80_vm1 = vcmask 293888   ;;  %vm1130_vm2 = vmmov 0   ;;  %s1348_s0 = inlined_call_operand.vmem [shape: bf16[64,36], index: 0, kind: input, shape index: {}]   ;;  %s1349_s1 = inlined_call_operand.vmem [shape: bf16[36,128], index: 1, kind: input, shape index: {}]   ;;  %s1350_s2 = inlined_call_operand.vmem [shape: bf16[32,128], index: 2, kind: input, shape index: {}]   ;;  %s1351_s3 = inlined_call_operand.vmem [shape: f32[1,128], index: 3, kind: input, shape index: {}]   ;;  %s1352_s4 = inlined_call_operand.vmem [shape: bf16[32,128], index: 4, kind: input, shape index: {}]   ;;  %s1353_s5 = inlined_call_operand.vmem [shape: f32[1,128], index: 5, kind: input, shape index: {}]   ;;  %s1354_s6 = inlined_call_operand.hbm [shape: f32[8,128], index: 6, kind: output, shape index: {}]  }
   0x1   :  { %v1026_v0 = vld [vmem:[%s1349_s1] sm:$0xff]   ;;  %v1027_v1 = vld [vmem:[%s1349_s1 + $0x8] sm:$0xff]   ;;  %947 = vmatprep.subr.bf16.mxu1 %v1129_v2  ;;  %v1029_v4 = vld [vmem:[%s1349_s1 + $0x10] ss:$0 sps:$4 sm:$0x33]   ;;  %951 = vmatprep.mubr.msk.bf16.mxu1 %vm1130_vm2, %v1129_v2 }
   0x2   :  { %933 = vmatprep.subr.bf16.mxu0 %v1026_v0  ;;  %v1180_v3 = vld [vmem:[%s1350_s2] sm:$0xff]   ;;  %v1188_v5 = vld [vmem:[%s1350_s2 + $0x8] sm:$0xff]   ;;  %v95_v7 = vsel %vm93_vm0, %v1029_v4, 0 }
   0x3   :  { %934 = vmatpush3.bf16.msra.mxu0 %v1026_v0  ;;  %948 = vmatpush3.bf16.msra.mxu1 %v1180_v3  ;;  %v1031_v6 = vld [vmem:[%s1348_s0] sm:$0xff]  }
   0x4   :  { %935 = vmatprep.subr.bf16.mxu0 %v1027_v1  ;;  %949 = vmatprep.subr.bf16.mxu1 %v1129_v2 }
   0x5   :  { %939 = vmatprep.mubr.msk.bf16.mxu0 %vm80_vm1, %v1031_v6 }
   0x7   :  { %936 = vmatpush3.bf16.msra.mxu0 %v1027_v1  ;;  %950 = vmatpush3.bf16.msra.mxu1 %v1188_v5 }
   0x8   :  { %1019 = vmatprep.subr.msk.bf16.mxu0 %vm93_vm0, %v1029_v4  ;;  %955 = vmatprep.subr.bf16.mxu1 %v1129_v2 }
   0x9   :  { %11 = vsyncpa [#allocation4], 0  ;;  %v1032_v8 = vld [vmem:[%s1348_s0 + $0x8] sm:$0xff]   ;;  %v1131_v9 = vmov 0   ;;  %v1220_v12 = vld [vmem:[%s1351_s3] ss:$0 sm:$0xff] }
   0xa   :  { %952 = vmatmul.mubr.bf16.vlgmr.msra.gmra.mrb[0].mxu1 %v1131_v9  ;;  %s1132_s11 = smov 64   ;;  %s1133_s3 = smov 32   ;;  %vm187_vm3 = vcmask 261120  }
   0xb   :  { %938 = vmatpush3.bf16.msra.mxu0 %v95_v7  ;;  %956 = vmatpush3.bf16.msra.mxu1 %v1180_v3 }
   0xc   :  { %959 = vmatprep.mubr.msk.bf16.mxu1 %vm1130_vm2, %v1129_v2  ;;  %957 = vmatprep.subr.bf16.mxu1 %v1129_v2 }
   0xd   :  { %971 = vmatprep.subr.bf16.mxu0 %v1129_v2 }
   0xe   :  { %940 = vmatmul.mubr.msk.bf16.vlgmr.msra.gmra.mrb[0].mxu0 %vm80_vm1, %v1032_v8 }
   0xf   :  { %972 = vmatpush3.bf16.msra.mxu0 %v1180_v3  ;;  %958 = vmatpush3.bf16.msra.mxu1 %v1188_v5 }
  0x10   :  { %973 = vmatprep.subr.bf16.mxu0 %v1129_v2  ;;  %963 = vmatprep.subr.bf16.mxu1 %v1129_v2 }
  0x13   :  { %974 = vmatpush3.bf16.msra.mxu0 %v1188_v5 }
  0x14   :  { %987 = vmatprep.subr.bf16.mxu0 %v1129_v2 }
  0xdd   :  { %v225_v10 = vpop.f32.mrb[0].mxu1 }
  0xde   :  { %v953_v11 = vpop.f32.mrb[1].mxu1 }
  0xdf   :  { %v228_v13 = vpop.f32.mrb[2].mxu1 }
  0xe0   :  { %v954_v15 = vpop.f32.mrb[3].mxu1  ;;  %v1033_v13 = vld [vmem:[%s1348_s0 + $0x10] sm:$0xff]  }
  0xe1   :  { %v1222_v14 = vpop.f32.mrb[0].mxu0  ;;  %943 = vmatprep.mubr.msk.bf16.mxu0 %vm80_vm1, %v1033_v13 }
  0xe2   :  { %v131_v16 = vpop.f32.mrb[1].mxu0  ;;  %v140_v57 = vadd.f32 %v1222_v14, %v1220_v12  ;;  %v1034_v14 = vld [vmem:[%s1348_s0 + $0x18] sm:$0xff]  }
  0xe3   :  { %v132_v17 = vadd.f32 %v1220_v12, %v131_v16  ;;  %v1225_v18 = vpop.f32.mrb[2].mxu0  ;;  %944 = vmatmul.mubr.msk.bf16.gmra.mrb[4].mxu0 %vm80_vm1, %v1034_v14 }
  0xe4   :  { %v134_v19 = vpop.f32.mrb[3].mxu0  ;;  %975 = vmatprep.mubr.msk.bf16.mxu0 %vm1130_vm2, %v1129_v2 }
  0xe5   :  { %v231_v20 = vadd.f32 %v225_v10, %v132_v17  ;;  %v135_v36 = vadd.f32 %v1220_v12, %v134_v19 }
  0xe7   :  { %1037 = vtanh.f32 %v231_v20  ;;  %v879_v22 = vmul.f32 -1.442695, %v231_v20 }
  0xe9   :  { %1039 = vpow2.f32 %v879_v22 }
  0xf1   :  { %v1038_v21 = vpop.eup %1037 }
  0xf2   :  { %241 = vrot.lane.b32.xlu0 %v1038_v21, %s1132_s11 }
  0xf3   :  { %v1040_v23 = vpop.eup %1039 }
  0xf4   :  { %v235_v24 = vadd.f32 1.0, %v1040_v23 }
  0xf6   :  { %1041 = vrcp.f32 %v235_v24 }
 0x100   :  { %v1042_v25 = vpop.eup %1041 }
 0x101   :  { %v239_v28 = vmul.f32 0.0, %v1042_v25 }
 0x164   :  { %v242_v26 = vpop.permute.xlu0 %241 }
 0x165   :  { %v244_v27 = vmul.f32 %v1042_v25, %v242_v26 }
 0x167   :  { %246 = vrot.lane.b32.xlu0 %v244_v27, %s1133_s3 }
 0x1b6   :  { %v1266_v20 = vpop.f32.mrb[4].mxu0 }
 0x1b7   :  { %v147_v21 = vpop.f32.mrb[5].mxu0 }
 0x1b8   :  { %v1268_v22 = vpop.f32.mrb[6].mxu0 }
 0x1b9   :  { %v1270_v23 = vpop.f32.mrb[7].mxu0 }
 0x1d9   :  { %v247_v29 = vpop.permute.xlu0 %246 }
 0x1da   :  { %v249_v30 = vadd.f32 %v247_v29, %v239_v28 }
 0x1dc   :  { %1043 = vtanh.f32 %v249_v30 }
 0x1e6   :  { %v1044_v31 = vpop.eup %1043 }
 0x1e7   :  { %252 = vrot.lane.b32.xlu1 %v1044_v31, %s1132_s11 }
 0x259   :  { %v253_v32 = vpop.permute.xlu1 %252 }
 0x25a   :  { %v255_v33 = vmul.f32 %v1042_v25, %v253_v32  ;;  %v143_v25 = vadd.f32 %v1225_v18, %v1220_v12 }
 0x25c   :  { %v258_v34 = vpack.c.bf16 %v255_v33, %v255_v33 }
 0x25e   :  { %260 = vrot.lane.b32.xlu1 %v258_v34, %s1133_s3 }
 0x2d0   :  { %v261_v35 = vpop.permute.xlu1 %260 }
 0x2d1   :  { %960 = vmatmul.mubr.msk.bf16.vlgmr.msra.gmra.mrb[4].mxu1 %vm187_vm3, %v261_v35 }
 0x2d2   :  { %964 = vmatpush3.bf16.msra.mxu1 %v1180_v3  ;;  %967 = vmatprep.mubr.msk.bf16.mxu1 %vm1130_vm2, %v1129_v2 }
 0x2d3   :  { %965 = vmatprep.subr.bf16.mxu1 %v1129_v2 }
 0x2d6   :  { %966 = vmatpush3.bf16.msra.mxu1 %v1188_v5 }
 0x2d7   :  { %979 = vmatprep.subr.bf16.mxu1 %v1129_v2 }
 0x3a4   :  { %v299_v37 = vpop.f32.mrb[4].mxu1 }
 0x3a5   :  { %v305_v38 = vadd.f32 %v299_v37, %v135_v36  ;;  %v961_v39 = vpop.f32.mrb[5].mxu1 }
 0x3a6   :  { %v302_v40 = vpop.f32.mrb[6].mxu1 }
 0x3a7   :  { %1045 = vtanh.f32 %v305_v38  ;;  %v962_v41 = vpop.f32.mrb[7].mxu1  ;;  %v881_v43 = vmul.f32 -1.442695, %v305_v38 }
 0x3a9   :  { %1047 = vpow2.f32 %v881_v43 }
 0x3b1   :  { %v1046_v42 = vpop.eup %1045 }
 0x3b2   :  { %315 = vrot.lane.b32.xlu0 %v1046_v42, %s1132_s11 }
 0x3b3   :  { %v1048_v44 = vpop.eup %1047 }
 0x3b4   :  { %v309_v45 = vadd.f32 1.0, %v1048_v44 }
 0x3b6   :  { %1049 = vrcp.f32 %v309_v45  ;;  %v148_v45 = vadd.f32 %v1220_v12, %v147_v21 }
 0x3c0   :  { %v1050_v46 = vpop.eup %1049 }
 0x3c1   :  { %v313_v49 = vmul.f32 %v1050_v46, %v249_v30 }
 0x424   :  { %v316_v47 = vpop.permute.xlu0 %315 }
 0x425   :  { %v318_v48 = vmul.f32 %v1050_v46, %v316_v47 }
 0x427   :  { %320 = vrot.lane.b32.xlu1 %v318_v48, %s1133_s3 }
 0x499   :  { %v321_v50 = vpop.permute.xlu1 %320 }
 0x49a   :  { %v323_v51 = vadd.f32 %v321_v50, %v313_v49 }
 0x49c   :  { %1051 = vtanh.f32 %v323_v51 }
 0x4a6   :  { %v1052_v52 = vpop.eup %1051 }
 0x4a7   :  { %326 = vrot.lane.b32.xlu0 %v1052_v52, %s1132_s11 }
 0x519   :  { %v327_v53 = vpop.permute.xlu0 %326 }
 0x51a   :  { %v329_v54 = vmul.f32 %v1050_v46, %v327_v53 }
 0x51c   :  { %v332_v55 = vpack.c.bf16 %v329_v54, %v329_v54 }
 0x51e   :  { %334 = vrot.lane.b32.xlu1 %v332_v55, %s1133_s3 }
 0x590   :  { %v335_v56 = vpop.permute.xlu1 %334 }
 0x591   :  { %968 = vmatmul.mubr.msk.bf16.vlgmr.msra.gmra.mrb[8].mxu1 %vm187_vm3, %v335_v56 }
 0x592   :  { %980 = vmatpush3.bf16.msra.mxu1 %v1180_v3  ;;  %983 = vmatprep.mubr.msk.bf16.mxu1 %vm1130_vm2, %v1129_v2 }
 0x593   :  { %981 = vmatprep.subr.bf16.mxu1 %v1129_v2 }
 0x596   :  { %982 = vmatpush3.bf16.msra.mxu1 %v1188_v5 }
 0x597   :  { %995 = vmatprep.subr.bf16.mxu1 %v1129_v2 }
 0x664   :  { %v373_v58 = vpop.f32.mrb[8].mxu1 }
 0x665   :  { %v379_v59 = vadd.f32 %v373_v58, %v140_v57  ;;  %v969_v60 = vpop.f32.mrb[9].mxu1 }
 0x666   :  { %v376_v61 = vpop.f32.mrb[10].mxu1 }
 0x667   :  { %1053 = vtanh.f32 %v379_v59  ;;  %v970_v62 = vpop.f32.mrb[11].mxu1  ;;  %v883_v0 = vmul.f32 -1.442695, %v379_v59 }
 0x669   :  { %1055 = vpow2.f32 %v883_v0 }
 0x671   :  { %v1054_v63 = vpop.eup %1053 }
 0x672   :  { %389 = vrot.lane.b32.xlu0 %v1054_v63, %s1132_s11 }
 0x673   :  { %v1056_v1 = vpop.eup %1055 }
 0x674   :  { %v383_v4 = vadd.f32 1.0, %v1056_v1 }
 0x676   :  { %1057 = vrcp.f32 %v383_v4  ;;  %v151_v4 = vadd.f32 %v1220_v12, %v1270_v23 }
 0x680   :  { %v1058_v6 = vpop.eup %1057 }
 0x681   :  { %v387_v9 = vmul.f32 %v1058_v6, %v323_v51 }
 0x6e4   :  { %v390_v7 = vpop.permute.xlu0 %389 }
 0x6e5   :  { %v392_v8 = vmul.f32 %v1058_v6, %v390_v7 }
 0x6e7   :  { %394 = vrot.lane.b32.xlu1 %v392_v8, %s1133_s3 }
 0x759   :  { %v395_v10 = vpop.permute.xlu1 %394 }
 0x75a   :  { %v397_v11 = vadd.f32 %v395_v10, %v387_v9 }
 0x75c   :  { %1059 = vtanh.f32 %v397_v11 }
 0x766   :  { %v1060_v15 = vpop.eup %1059 }
 0x767   :  { %400 = vrot.lane.b32.xlu0 %v1060_v15, %s1132_s11 }
 0x7d9   :  { %v401_v16 = vpop.permute.xlu0 %400 }
 0x7da   :  { %v403_v17 = vmul.f32 %v1058_v6, %v401_v16 }
 0x7dc   :  { %v406_v19 = vpack.c.bf16 %v403_v17, %v403_v17 }
 0x7de   :  { %408 = vrot.lane.b32.xlu1 %v406_v19, %s1133_s3 }
 0x850   :  { %v409_v24 = vpop.permute.xlu1 %408 }
 0x851   :  { %976 = vmatmul.mubr.msk.bf16.vlgmr.msra.gmra.mrb[8].mxu0 %vm187_vm3, %v409_v24 }
 0x852   :  { %988 = vmatpush3.bf16.msra.mxu0 %v1180_v3  ;;  %991 = vmatprep.mubr.msk.bf16.mxu0 %vm1130_vm2, %v1129_v2 }
 0x853   :  { %989 = vmatprep.subr.bf16.mxu0 %v1129_v2 }
 0x856   :  { %990 = vmatpush3.bf16.msra.mxu0 %v1188_v5 }
 0x857   :  { %1003 = vmatprep.subr.bf16.mxu0 %v1129_v2 }
 0x924   :  { %v447_v26 = vpop.f32.mrb[8].mxu0 }
 0x925   :  { %v453_v27 = vadd.f32 %v447_v26, %v143_v25  ;;  %v977_v28 = vpop.f32.mrb[9].mxu0 }
 0x926   :  { %v450_v29 = vpop.f32.mrb[10].mxu0  ;;  %v156_v28 = vadd.f32 %v1266_v20, %v1220_v12 }
 0x927   :  { %1061 = vtanh.f32 %v453_v27  ;;  %v978_v30 = vpop.f32.mrb[11].mxu0  ;;  %v885_v32 = vmul.f32 -1.442695, %v453_v27 }
 0x929   :  { %1063 = vpow2.f32 %v885_v32 }
 0x931   :  { %v1062_v31 = vpop.eup %1061 }
 0x932   :  { %463 = vrot.lane.b32.xlu0 %v1062_v31, %s1132_s11 }
 0x933   :  { %v1064_v33 = vpop.eup %1063 }
 0x934   :  { %v457_v34 = vadd.f32 1.0, %v1064_v33 }
 0x936   :  { %1065 = vrcp.f32 %v457_v34 }
 0x940   :  { %v1066_v35 = vpop.eup %1065 }
 0x941   :  { %v461_v18 = vmul.f32 %v1066_v35, %v397_v11 }
 0x9a4   :  { %v464_v36 = vpop.permute.xlu0 %463 }
 0x9a5   :  { %v466_v37 = vmul.f32 %v1066_v35, %v464_v36 }
 0x9a7   :  { %468 = vrot.lane.b32.xlu1 %v466_v37, %s1133_s3 }
 0xa19   :  { %v469_v38 = vpop.permute.xlu1 %468 }
 0xa1a   :  { %v471_v39 = vadd.f32 %v469_v38, %v461_v18 }
 0xa1c   :  { %1067 = vtanh.f32 %v471_v39 }
 0xa26   :  { %v1068_v40 = vpop.eup %1067 }
 0xa27   :  { %474 = vrot.lane.b32.xlu0 %v1068_v40, %s1132_s11 }
 0xa99   :  { %v475_v41 = vpop.permute.xlu0 %474 }
 0xa9a   :  { %v477_v42 = vmul.f32 %v1066_v35, %v475_v41 }
 0xa9c   :  { %v480_v43 = vpack.c.bf16 %v477_v42, %v477_v42 }
 0xa9e   :  { %482 = vrot.lane.b32.xlu1 %v480_v43, %s1133_s3 }
 0xb10   :  { %v483_v44 = vpop.permute.xlu1 %482 }
 0xb11   :  { %984 = vmatmul.mubr.msk.bf16.vlgmr.msra.gmra.mrb[12].mxu1 %vm187_vm3, %v483_v44 }
 0xb12   :  { %996 = vmatpush3.bf16.msra.mxu1 %v1180_v3  ;;  %999 = vmatprep.mubr.msk.bf16.mxu1 %vm1130_vm2, %v1129_v2 }
 0xb13   :  { %997 = vmatprep.subr.bf16.mxu1 %v1129_v2 }
 0xb16   :  { %998 = vmatpush3.bf16.msra.mxu1 %v1188_v5 }
 0xb17   :  { %1011 = vmatprep.subr.bf16.mxu1 %v1129_v2 }
 0xbe4   :  { %v521_v46 = vpop.f32.mrb[12].mxu1 }
 0xbe5   :  { %v527_v47 = vadd.f32 %v521_v46, %v148_v45  ;;  %v985_v48 = vpop.f32.mrb[13].mxu1 }
 0xbe6   :  { %v524_v49 = vpop.f32.mrb[14].mxu1 }
 0xbe7   :  { %1069 = vtanh.f32 %v527_v47  ;;  %v986_v50 = vpop.f32.mrb[15].mxu1  ;;  %v887_v52 = vmul.f32 -1.442695, %v527_v47  ;;  %v159_v47 = vadd.f32 %v1268_v22, %v1220_v12 }
 0xbe9   :  { %1071 = vpow2.f32 %v887_v52 }
 0xbf1   :  { %v1070_v51 = vpop.eup %1069 }
 0xbf2   :  { %537 = vrot.lane.b32.xlu0 %v1070_v51, %s1132_s11 }
 0xbf3   :  { %v1072_v53 = vpop.eup %1071 }
 0xbf4   :  { %v531_v54 = vadd.f32 1.0, %v1072_v53 }
 0xbf6   :  { %1073 = vrcp.f32 %v531_v54 }
 0xc00   :  { %v1074_v55 = vpop.eup %1073 }
 0xc01   :  { %v535_v58 = vmul.f32 %v1074_v55, %v471_v39 }
 0xc64   :  { %v538_v56 = vpop.permute.xlu0 %537 }
 0xc65   :  { %v540_v57 = vmul.f32 %v1074_v55, %v538_v56 }
 0xc67   :  { %542 = vrot.lane.b32.xlu1 %v540_v57, %s1133_s3 }
 0xcd9   :  { %v543_v59 = vpop.permute.xlu1 %542 }
 0xcda   :  { %v545_v60 = vadd.f32 %v543_v59, %v535_v58 }
 0xcdc   :  { %1075 = vtanh.f32 %v545_v60 }
 0xce6   :  { %v1076_v61 = vpop.eup %1075 }
 0xce7   :  { %548 = vrot.lane.b32.xlu0 %v1076_v61, %s1132_s11  ;;  %v1035_v61 = vld [vmem:[%s1352_s4] sm:$0xff]  }
 0xd59   :  { %v549_v62 = vpop.permute.xlu0 %548 }
 0xd5a   :  { %v551_v63 = vmul.f32 %v1074_v55, %v549_v62  ;;  %v1036_v62 = vld [vmem:[%s1352_s4 + $0x8] sm:$0xff]   ;;  %s1134_s4 = smov [#allocation3]  }
 0xd5b   :  { %s857_s21 = sshll.u32 %s1134_s4, 4  ;;  %s858_s21 = int_to_ptr.vmem [resolvable:$true] %s857_s21 }
 0xd5c   :  { %v554_v0 = vpack.c.bf16 %v551_v63, %v551_v63  ;;  %s1105_s22 = scalar_lea.vmem %s858_s21, 128  ;;  %p1110_p1 = scmp.lt.s32.totalorder %s858_s21, %s858_s21 }
 0xd5d   :  { %p1106_p0 = scmp.ne.s32.totalorder %s858_s21, %s1105_s22  ;;  %p1111_p2 = scmp.lt.s32.totalorder %s1105_s22, %s1105_s22 }
 0xd5e   :  { %556 = vrot.lane.b32.xlu1 %v554_v0, %s1133_s3 }
 0xd5f   :  { %p1112_p3 = por %p1111_p2, %p1110_p1 }
 0xd61   :  { %p1113_p4 = pnand %p1112_p3, %p1106_p0 }
 0xdd0   :  { %v557_v1 = vpop.permute.xlu1 %556 }
 0xdd1   :  { %992 = vmatmul.mubr.msk.bf16.vlgmr.msra.gmra.mrb[12].mxu0 %vm187_vm3, %v557_v1 }
 0xdd2   :  { %1004 = vmatpush3.bf16.msra.mxu0 %v1180_v3  ;;  %1007 = vmatprep.mubr.msk.bf16.mxu0 %vm1130_vm2, %v1129_v2 }
 0xdd3   :  { %1005 = vmatprep.subr.bf16.mxu0 %v1129_v2 }
 0xdd6   :  { %1006 = vmatpush3.bf16.msra.mxu0 %v1188_v5 }
 0xea4   :  { %v595_v6 = vpop.f32.mrb[12].mxu0 }
 0xea5   :  { %v601_v7 = vadd.f32 %v595_v6, %v151_v4  ;;  %v993_v8 = vpop.f32.mrb[13].mxu0 }
 0xea6   :  { %v598_v9 = vpop.f32.mrb[14].mxu0 }
 0xea7   :  { %1077 = vtanh.f32 %v601_v7  ;;  %v994_v10 = vpop.f32.mrb[15].mxu0  ;;  %v889_v3 = vmul.f32 -1.442695, %v601_v7  ;;  %v894_v7 = vld [vmem:[%s1353_s5] ss:$0 sm:$0xff] }
 0xea9   :  { %1079 = vpow2.f32 %v889_v3 }
 0xeb1   :  { %v1078_v11 = vpop.eup %1077 }
 0xeb2   :  { %611 = vrot.lane.b32.xlu0 %v1078_v11, %s1132_s11 }
 0xeb3   :  { %v1080_v13 = vpop.eup %1079 }
 0xeb4   :  { %v605_v14 = vadd.f32 1.0, %v1080_v13 }
 0xeb6   :  { %1081 = vrcp.f32 %v605_v14 }
 0xec0   :  { %v1082_v15 = vpop.eup %1081 }
 0xec1   :  { %v609_v17 = vmul.f32 %v1082_v15, %v545_v60 }
 0xf24   :  { %v612_v16 = vpop.permute.xlu0 %611 }
 0xf25   :  { %v614_v5 = vmul.f32 %v1082_v15, %v612_v16 }
 0xf27   :  { %616 = vrot.lane.b32.xlu1 %v614_v5, %s1133_s3 }
 0xf99   :  { %v617_v19 = vpop.permute.xlu1 %616 }
 0xf9a   :  { %v619_v21 = vadd.f32 %v617_v19, %v609_v17 }
 0xf9c   :  { %1083 = vtanh.f32 %v619_v21 }
 0xfa6   :  { %v1084_v23 = vpop.eup %1083 }
 0xfa7   :  { %622 = vrot.lane.b32.xlu0 %v1084_v23, %s1132_s11 }
0x1019   :  { %v623_v24 = vpop.permute.xlu0 %622 }
0x101a   :  { %v625_v25 = vmul.f32 %v1082_v15, %v623_v24 }
0x101c   :  { %v628_v26 = vpack.c.bf16 %v625_v25, %v625_v25 }
0x101e   :  { %630 = vrot.lane.b32.xlu1 %v628_v26, %s1133_s3 }
0x1090   :  { %v631_v27 = vpop.permute.xlu1 %630 }
0x1091   :  { %1000 = vmatmul.mubr.msk.bf16.vlgmr.msra.gmra.mrb[16].mxu1 %vm187_vm3, %v631_v27 }
0x1092   :  { %1015 = vmatprep.mubr.msk.bf16.mxu1 %vm1130_vm2, %v1129_v2  ;;  %1012 = vmatpush3.bf16.msra.mxu1 %v1035_v61 }
0x1093   :  { %1013 = vmatprep.subr.bf16.mxu1 %v1129_v2 }
0x1096   :  { %1014 = vmatpush3.bf16.msra.mxu1 %v1036_v62 }
0x1164   :  { %v669_v29 = vpop.f32.mrb[16].mxu1 }
0x1165   :  { %v675_v30 = vadd.f32 %v669_v29, %v156_v28  ;;  %v1001_v31 = vpop.f32.mrb[17].mxu1 }
0x1166   :  { %v672_v32 = vpop.f32.mrb[18].mxu1 }
0x1167   :  { %1085 = vtanh.f32 %v675_v30  ;;  %v1002_v33 = vpop.f32.mrb[19].mxu1  ;;  %v891_v35 = vmul.f32 -1.442695, %v675_v30 }
0x1169   :  { %1087 = vpow2.f32 %v891_v35 }
0x1171   :  { %v1086_v34 = vpop.eup %1085 }
0x1172   :  { %685 = vrot.lane.b32.xlu0 %v1086_v34, %s1132_s11 }
0x1173   :  { %v1088_v36 = vpop.eup %1087 }
0x1174   :  { %v679_v37 = vadd.f32 1.0, %v1088_v36 }
0x1176   :  { %1089 = vrcp.f32 %v679_v37 }
0x1180   :  { %v1090_v18 = vpop.eup %1089 }
0x1181   :  { %v683_v20 = vmul.f32 %v1090_v18, %v619_v21 }
0x11e4   :  { %v686_v38 = vpop.permute.xlu0 %685 }
0x11e5   :  { %v688_v39 = vmul.f32 %v1090_v18, %v686_v38 }
0x11e7   :  { %690 = vrot.lane.b32.xlu1 %v688_v39, %s1133_s3 }
0x1259   :  { %v691_v40 = vpop.permute.xlu1 %690 }
0x125a   :  { %v693_v41 = vadd.f32 %v691_v40, %v683_v20 }
0x125c   :  { %1091 = vtanh.f32 %v693_v41 }
0x1266   :  { %v1092_v42 = vpop.eup %1091 }
0x1267   :  { %696 = vrot.lane.b32.xlu0 %v1092_v42, %s1132_s11 }
0x12d9   :  { %v697_v43 = vpop.permute.xlu0 %696 }
0x12da   :  { %v699_v44 = vmul.f32 %v1090_v18, %v697_v43 }
0x12dc   :  { %v702_v45 = vpack.c.bf16 %v699_v44, %v699_v44 }
0x12de   :  { %704 = vrot.lane.b32.xlu1 %v702_v45, %s1133_s3 }
0x1350   :  { %v705_v46 = vpop.permute.xlu1 %704 }
0x1351   :  { %1008 = vmatmul.mubr.msk.bf16.vlgmr.msra.gmra.mrb[16].mxu0 %vm187_vm3, %v705_v46 }
0x1424   :  { %v743_v48 = vpop.f32.mrb[16].mxu0 }
0x1425   :  { %v749_v49 = vadd.f32 %v743_v48, %v159_v47  ;;  %v1009_v50 = vpop.f32.mrb[17].mxu0 }
0x1426   :  { %v746_v51 = vpop.f32.mrb[18].mxu0 }
0x1427   :  { %1093 = vtanh.f32 %v749_v49  ;;  %v1010_v52 = vpop.f32.mrb[19].mxu0  ;;  %v893_v54 = vmul.f32 -1.442695, %v749_v49 }
0x1429   :  { %1095 = vpow2.f32 %v893_v54 }
0x1431   :  { %v1094_v53 = vpop.eup %1093 }
0x1432   :  { %759 = vrot.lane.b32.xlu0 %v1094_v53, %s1132_s11 }
0x1433   :  { %v1096_v55 = vpop.eup %1095 }
0x1434   :  { %v753_v56 = vadd.f32 1.0, %v1096_v55 }
0x1436   :  { %1097 = vrcp.f32 %v753_v56 }
0x1440   :  { %v1098_v57 = vpop.eup %1097 }
0x1441   :  { %v757_v12 = vmul.f32 %v1098_v57, %v693_v41 }
0x14a4   :  { %v760_v58 = vpop.permute.xlu0 %759 }
0x14a5   :  { %v762_v59 = vmul.f32 %v1098_v57, %v760_v58 }
0x14a7   :  { %764 = vrot.lane.b32.xlu1 %v762_v59, %s1133_s3 }
0x1519   :  { %v765_v22 = vpop.permute.xlu1 %764 }
0x151a   :  { %v767_v60 = vadd.f32 %v765_v22, %v757_v12 }
0x151c   :  { %1099 = vtanh.f32 %v767_v60 }
0x1526   :  { %v1100_v63 = vpop.eup %1099 }
0x1527   :  { %770 = vrot.lane.b32.xlu0 %v1100_v63, %s1132_s11 }
0x1599   :  { %v771_v0 = vpop.permute.xlu0 %770 }
0x159a   :  { %v773_v1 = vmul.f32 %v1098_v57, %v771_v0 }
0x159c   :  { %v774_v4 = vpack.c.bf16 %v773_v1, %v773_v1 }
0x159e   :  { %787 = vrot.lane.b32.xlu1 %v774_v4, %s1133_s3 }
0x1610   :  { %v788_v6 = vpop.permute.xlu1 %787 }
0x1611   :  { %1016 = vmatmul.mubr.msk.bf16.vlgmr.msra.gmra.mrb[20].mxu1 %vm187_vm3, %v788_v6 }
0x16e4   :  { %v838_v8 = vpop.f32.mrb[20].mxu1 }
0x16e5   :  { %v839_v9 = vadd.f32 %v894_v7, %v838_v8  ;;  %v1017_v10 = vpop.f32.mrb[21].mxu1 }
0x16e6   :  { %v841_v2 = vpop.f32.mrb[22].mxu1 }
0x16e7   :  { %v898_v11 = vmul.f32 -1.442695, %v839_v9  ;;  %v1018_v3 = vpop.f32.mrb[23].mxu1 }
0x16e9   :  { %1101 = vpow2.f32 %v898_v11 }
0x16f3   :  { %v1102_v13 = vpop.eup %1101 }
0x16f4   :  { %v847_v14 = vadd.f32 1.0, %v1102_v13 }
0x16f6   :  { %1103 = vrcp.f32 %v847_v14 }
0x1700   :  { %v1104_v15 = vpop.eup %1103 }
0x1701   :  { %850 = vst [vmem:[#allocation3] sm:$0xff] %v1104_v15 }
0x1702   :  { %1116 = shalt.err (!%p1113_p4)
}
0x1703   :  { %s1117_s24 = scalar_lea.hbm %s1354_s6, 128 }
0x1704   :  { %p1118_p5 = scmp.ne.s32.totalorder %s1354_s6, %s1117_s24  ;;  %p1121_p6 = scmp.lt.u32.totalorder %s1117_s24, %s1354_s6 }
0x1706   :  { %p1123_p7 = pnand %p1121_p6, %p1118_p5 }
0x1708   :  { %1126 = shalt.err (!%p1123_p7)
}
0x1709   :  { %860 = dma.vmem_to_hbm [thread:$0]  %s858_s21, 128, %s1354_s6, [#allocation4]  }
0x170a   :  { %1127 = dma.done.wait [#allocation4], 128  }
0x170b   :  { %1128 = vsyncadd [#allocation4], 4294967168 }
0x170c   :  { %864 = vsyncpa [#allocation4], 1 }

</bundles_post_ra>
